<compile_context>
chip_gen: v6e
topology: v6e:2x2x1
jax: 0.10.0
libtpu: 0.0.40
codegen_flags: <defaults>
</compile_context>

<pallas_src>
import functools

import jax
import jax.numpy as jnp
from jax.experimental import pallas as pl
from jax.experimental.pallas import tpu as pltpu

LANE = 128


def _round_up(x, m):
    return (x + m - 1) // m * m


def _cdiv(a, b):
    return -(-a // b)


def _choose_tile_b(batch, tile_b_max=2048):
    """Batch-tile size (always a multiple of 8).

    - tiny batch: one step.
    - moderate batch: aim for (at least) 2 grid steps so v7x's two TensorCores
      both get work (the extra step is noise on single-TC v5e/v6e).
    - large batch: fewest, largest tiles (per-step overhead bound kernel);
      tile_b_max=2048 keeps the double-buffered obs/out tiles + live f32
      activations far under the 32 MiB scoped VMEM limit on all generations
      (including v7x's 64 MiB part).
    """
    b8 = _round_up(batch, 8)
    if b8 > tile_b_max:
        return tile_b_max
    if b8 >= 64:
        return _round_up(_cdiv(b8, 2), 8)
    return b8


def _pid_actor_kernel(x_ref, w_ref, b_ref, o_ref, *, layer_meta, act_limit):
    """One batch tile of the fused MLP.

    x_ref: (tile_b, obs_dim)      f32  (obs stream; cast to bf16 here)
    w_ref: (slab_rows, h_pad)     bf16 (all layers' weights, packed + padded)
    b_ref: (num_layers, h_pad)    f32  (biases, zero-padded to h_pad lanes)
    o_ref: (tile_b, h_pad)        f32  (lane-dense epilogue slab)
    """
    h = x_ref[...].astype(jnp.bfloat16)              # in-kernel cast, no wrapper pre-pass
    num_layers = len(layer_meta)
    for li, (off, k) in enumerate(layer_meta):
        w = w_ref[off:off + k, :]                    # (k, h_pad) bf16, static slice
        b = b_ref[li:li + 1, :]                      # (1, h_pad)  f32
        z = jnp.dot(h, w, preferred_element_type=jnp.float32) + b
        if li < num_layers - 1:
            # hidden activation: ReLU in f32, back to bf16 for the next MXU pass
            h = jnp.maximum(z, 0.0).astype(jnp.bfloat16)
        else:
            # output activation: act_limit * sigmoid(z) on the EUP (exp + vrcp),
            # stored lane-dense over the full h_pad slab.
            y = act_limit * pl.reciprocal(1.0 + jnp.exp(-z), approx=True)
            o_ref[...] = y.astype(o_ref.dtype)


def _build_weight_slab(weights, h_pad, dtype):
    """Pack [W0, W1, ...] into one lane-padded, 8-row-aligned bf16 slab.

    Layer 0 occupies round_up(obs_dim, 8) rows (kernel slices only the first
    obs_dim of them); every later layer occupies h_pad rows.  Padding rows /
    lanes are zero so they contribute nothing to the matmuls and keep the
    hidden activations lane-dense between layers.
    """
    blocks, meta, off = [], [], 0
    for i, w in enumerate(weights):
        in_i, out_i = w.shape
        rows = _round_up(in_i, 8) if i == 0 else h_pad
        assert in_i <= rows and out_i <= h_pad
        blk = jnp.zeros((rows, h_pad), jnp.float32).at[:in_i, :out_i].set(w)
        blocks.append(blk)
        meta.append((off, in_i if i == 0 else h_pad))  # (row offset, matmul K)
        off += rows
    slab = jnp.concatenate(blocks, axis=0).astype(dtype)
    return slab, tuple(meta)


def _build_bias_mat(biases, h_pad):
    bm = jnp.zeros((len(biases), h_pad), jnp.float32)
    for i, b in enumerate(biases):
        bm = bm.at[i, : b.shape[0]].set(jnp.reshape(b, (-1,)))
    return bm


def pid_actor_forward(obs, weights, biases, act_limit, *, tile_b_max=2048):
    """obs: [B, obs_dim] f32; weights[i]: [in_i, out_i] f32; biases[i]: [out_i] f32."""
    B, obs_dim = obs.shape
    act_dim = weights[-1].shape[1]
    num_layers = len(weights)
    h_pad = _round_up(max(w.shape[1] for w in weights), LANE)

    tile_b = _choose_tile_b(B, tile_b_max)
    grid = _cdiv(B, tile_b)
    b_exec = grid * tile_b

    # Pad batch rows only if the grid is ragged (same dtype, tiny copy); the
    # padded rows compute finite garbage and are sliced off below.
    obs_in = obs if b_exec == B else jnp.pad(obs, ((0, b_exec - B), (0, 0)))

    slab, layer_meta = _build_weight_slab(weights, h_pad, jnp.bfloat16)
    bias_mat = _build_bias_mat(biases, h_pad)

    kernel = functools.partial(
        _pid_actor_kernel, layer_meta=layer_meta, act_limit=float(act_limit)
    )

    # Cost estimate reflects the padded shapes the kernel actually executes.
    flops = 2 * b_exec * h_pad * (obs_dim + (num_layers - 1) * h_pad)
    bytes_accessed = (
        int(obs_in.size) * 4          # f32 obs stream
        + int(slab.size) * 2          # bf16 weight slab
        + int(bias_mat.size) * 4      # f32 biases
        + b_exec * h_pad * 4          # lane-dense f32 output slab
    )

    out = pl.pallas_call(
        kernel,
        out_shape=jax.ShapeDtypeStruct((b_exec, h_pad), jnp.float32),
        grid_spec=pltpu.PrefetchScalarGridSpec(
            num_scalar_prefetch=0,
            grid=(grid,),
            in_specs=[
                pl.BlockSpec((tile_b, obs_dim), lambda i: (i, 0)),   # obs stream (f32)
                pl.BlockSpec(slab.shape, lambda i: (0, 0)),          # weights, VMEM-resident
                pl.BlockSpec(bias_mat.shape, lambda i: (0, 0)),      # f32 biases, VMEM-resident
            ],
            out_specs=pl.BlockSpec((tile_b, h_pad), lambda i: (i, 0)),  # lane-dense store
        ),
        compiler_params=pltpu.CompilerParams(
            dimension_semantics=("parallel",),
            vmem_limit_bytes=32 * 1024 * 1024,
        ),
        cost_estimate=pl.CostEstimate(
            flops=flops,
            transcendentals=b_exec * h_pad,
            bytes_accessed=bytes_accessed,
        ),
    )(obs_in, slab, bias_mat)
    return out[:B, :act_dim]


def init_params(key, obs_dim, hidden_sizes, act_dim):
    """Deterministic synthetic init (uniform, PyTorch-Linear-like fan_in bound)."""
    sizes = [obs_dim] + list(hidden_sizes) + [act_dim]
    weights, biases = [], []
    for i in range(len(sizes) - 1):
        key, kw, kb = jax.random.split(key, 3)
        bound = 1.0 / float(sizes[i]) ** 0.5
        w = jax.random.uniform(kw, (sizes[i], sizes[i + 1]), jnp.float32, -bound, bound)
        b = jax.random.uniform(kb, (sizes[i + 1],), jnp.float32, -bound, bound)
        weights.append(w)
        biases.append(b)
    return weights, biases


def reference_forward(obs, weights, biases, act_limit, bf16_matmul=False):
    """Pure-JAX reference.

    bf16_matmul=True mirrors the kernel's numerics: bf16 matmul operands with
    f32 accumulation, f32 biases, f32 activations.
    """
    def mm(a, w):
        if bf16_matmul:
            a = a.astype(jnp.bfloat16).astype(jnp.float32)
            w = w.astype(jnp.bfloat16).astype(jnp.float32)
        return a @ w

    h = obs
    n = len(weights)
    for i, (w, b) in enumerate(zip(weights, biases)):
        z = mm(h, w) + b
        h = jnp.maximum(z, 0.0) if i < n - 1 else jax.nn.sigmoid(z)
    return act_limit * h


if __name__ == "__main__":
    obs_dim = 16
    act_dim = 4
    hidden_sizes = (32, 32)
    act_limit = 2.0

    key = jax.random.PRNGKey(0)
    key, k_obs_s, k_obs_l = jax.random.split(key, 3)
    weights, biases = init_params(key, obs_dim, hidden_sizes, act_dim)

    # Small batch (single grid step, no padding).
    obs_s = jax.random.normal(k_obs_s, (8, obs_dim), jnp.float32)
    out_s = jax.block_until_ready(pid_actor_forward(obs_s, weights, biases, act_limit))
    assert out_s.shape == (8, act_dim)
    ref_s_match = reference_forward(obs_s, weights, biases, act_limit, bf16_matmul=True)
    ref_s_f32 = reference_forward(obs_s, weights, biases, act_limit, bf16_matmul=False)
    assert jnp.allclose(out_s, ref_s_match, atol=2e-3, rtol=2e-3)
    assert jnp.allclose(out_s, ref_s_f32, atol=2e-2, rtol=2e-2)

    # Larger, non-multiple batch (exercises 2-step grid + ragged batch padding).
    obs_l = jax.random.normal(k_obs_l, (200, obs_dim), jnp.float32)
    out_l = jax.block_until_ready(pid_actor_forward(obs_l, weights, biases, act_limit))
    assert out_l.shape == (200, act_dim)
    ref_l_match = reference_forward(obs_l, weights, biases, act_limit, bf16_matmul=True)
    ref_l_f32 = reference_forward(obs_l, weights, biases, act_limit, bf16_matmul=False)
    assert jnp.allclose(out_l, ref_l_match, atol=2e-3, rtol=2e-3)
    assert jnp.allclose(out_l, ref_l_f32, atol=2e-2, rtol=2e-2)

    print("KERNEL_OK")
</pallas_src>

<mosaic_0001>
module attributes {stable_mosaic.version = 11 : i64} {
  func.func @_pid_actor_kernel(%arg0: i32, %arg1: memref<8x16xf32, #tpu.memory_space<vmem>>, %arg2: memref<272x128xbf16, #tpu.memory_space<vmem>>, %arg3: memref<3x128xf32, #tpu.memory_space<vmem>>, %arg4: memref<8x128xf32, #tpu.memory_space<vmem>>) attributes {dimension_semantics = [#tpu.dimension_semantics<parallel>], iteration_bounds = array<i64: 1>, scalar_prefetch = 0 : i64, scratch_operands = 0 : i64, tpu.core_type = #tpu.core_type<tc>, window_params = [{transform_indices = @transform_0, window_bounds = array<i64: 8, 16>}, {pipeline_mode = #tpu.pipeline_mode<synchronous>, transform_indices = @transform_1, window_bounds = array<i64: 272, 128>}, {pipeline_mode = #tpu.pipeline_mode<synchronous>, transform_indices = @transform_2, window_bounds = array<i64: 3, 128>}, {transform_indices = @transform_3, window_bounds = array<i64: 8, 128>}]} {
    %c0 = arith.constant 0 : index
    %c0_0 = arith.constant 0 : index
    %0 = vector.load %arg1[%c0, %c0_0] : memref<8x16xf32, #tpu.memory_space<vmem>>, vector<8x16xf32>
    %1 = arith.truncf %0 : vector<8x16xf32> to vector<8x16xbf16>
    %c0_1 = arith.constant 0 : index
    %c0_2 = arith.constant 0 : index
    %2 = vector.load %arg2[%c0_1, %c0_2] : memref<272x128xbf16, #tpu.memory_space<vmem>>, vector<16x128xbf16>
    %c0_3 = arith.constant 0 : index
    %c0_4 = arith.constant 0 : index
    %3 = vector.load %arg3[%c0_3, %c0_4] : memref<3x128xf32, #tpu.memory_space<vmem>>, vector<1x128xf32>
    %cst = arith.constant dense<0.000000e+00> : vector<8x128xf32>
    %4 = tpu.matmul %1, %2, %cst {dimension_numbers = #tpu.dot_dimension_numbers<[1], [0], [0], [1], [0, 0, 1, 1], [], []>} : vector<8x16xbf16>, vector<16x128xbf16>, vector<8x128xf32> -> vector<8x128xf32>
    %5 = vector.broadcast %3 : vector<1x128xf32> to vector<8x128xf32>
    %6 = arith.addf %4, %5 : vector<8x128xf32>
    %cst_5 = arith.constant 0.000000e+00 : f32
    %7 = vector.broadcast %cst_5 : f32 to vector<8x128xf32>
    %8 = arith.maximumf %6, %7 : vector<8x128xf32>
    %9 = arith.truncf %8 : vector<8x128xf32> to vector<8x128xbf16>
    %c16 = arith.constant 16 : index
    %c0_6 = arith.constant 0 : index
    %10 = vector.load %arg2[%c16, %c0_6] : memref<272x128xbf16, #tpu.memory_space<vmem>>, vector<128x128xbf16>
    %c1 = arith.constant 1 : index
    %c0_7 = arith.constant 0 : index
    %11 = vector.load %arg3[%c1, %c0_7] : memref<3x128xf32, #tpu.memory_space<vmem>>, vector<1x128xf32>
    %cst_8 = arith.constant dense<0.000000e+00> : vector<8x128xf32>
    %12 = tpu.matmul %9, %10, %cst_8 {dimension_numbers = #tpu.dot_dimension_numbers<[1], [0], [0], [1], [0, 0, 1, 1], [], []>} : vector<8x128xbf16>, vector<128x128xbf16>, vector<8x128xf32> -> vector<8x128xf32>
    %13 = vector.broadcast %11 : vector<1x128xf32> to vector<8x128xf32>
    %14 = arith.addf %12, %13 : vector<8x128xf32>
    %cst_9 = arith.constant 0.000000e+00 : f32
    %15 = vector.broadcast %cst_9 : f32 to vector<8x128xf32>
    %16 = arith.maximumf %14, %15 : vector<8x128xf32>
    %17 = arith.truncf %16 : vector<8x128xf32> to vector<8x128xbf16>
    %c144 = arith.constant 144 : index
    %c0_10 = arith.constant 0 : index
    %18 = vector.load %arg2[%c144, %c0_10] : memref<272x128xbf16, #tpu.memory_space<vmem>>, vector<128x128xbf16>
    %c2 = arith.constant 2 : index
    %c0_11 = arith.constant 0 : index
    %19 = vector.load %arg3[%c2, %c0_11] : memref<3x128xf32, #tpu.memory_space<vmem>>, vector<1x128xf32>
    %cst_12 = arith.constant dense<0.000000e+00> : vector<8x128xf32>
    %20 = tpu.matmul %17, %18, %cst_12 {dimension_numbers = #tpu.dot_dimension_numbers<[1], [0], [0], [1], [0, 0, 1, 1], [], []>} : vector<8x128xbf16>, vector<128x128xbf16>, vector<8x128xf32> -> vector<8x128xf32>
    %21 = vector.broadcast %19 : vector<1x128xf32> to vector<8x128xf32>
    %22 = arith.addf %20, %21 : vector<8x128xf32>
    %cst_13 = arith.constant 0.000000e+00 : f32
    %23 = vector.broadcast %cst_13 : f32 to vector<8x128xf32>
    %24 = arith.subf %23, %22 : vector<8x128xf32>
    %25 = math.exp %24 : vector<8x128xf32>
    %cst_14 = arith.constant 1.000000e+00 : f32
    %26 = vector.broadcast %cst_14 : f32 to vector<8x128xf32>
    %27 = arith.addf %26, %25 : vector<8x128xf32>
    %28 = tpu.reciprocal %27 {approx = true} : vector<8x128xf32> -> vector<8x128xf32>
    %cst_15 = arith.constant 2.000000e+00 : f32
    %29 = vector.broadcast %cst_15 : f32 to vector<8x128xf32>
    %30 = arith.mulf %29, %28 : vector<8x128xf32>
    %c0_16 = arith.constant 0 : index
    %c0_17 = arith.constant 0 : index
    %31 = vector.load %arg4[%c0_16, %c0_17] : memref<8x128xf32, #tpu.memory_space<vmem>>, vector<8x128xf32>
    tpu.vector_store %arg4[%c0_16, %c0_17], %30 {strides = array<i32>} : memref<8x128xf32, #tpu.memory_space<vmem>>, vector<8x128xf32>,
    return
  }
  func.func @transform_0(%arg0: i32) -> (i32, i32) {
    %c0_i32 = arith.constant 0 : i32
    %c0_i32_0 = arith.constant 0 : i32
    return %arg0, %c0_i32 : i32, i32
  }
  func.func @transform_1(%arg0: i32) -> (i32, i32) {
    %c0_i32 = arith.constant 0 : i32
    %c0_i32_0 = arith.constant 0 : i32
    %c0_i32_1 = arith.constant 0 : i32
    return %c0_i32, %c0_i32_0 : i32, i32
  }
  func.func @transform_2(%arg0: i32) -> (i32, i32) {
    %c0_i32 = arith.constant 0 : i32
    %c0_i32_0 = arith.constant 0 : i32
    %c0_i32_1 = arith.constant 0 : i32
    return %c0_i32, %c0_i32_0 : i32, i32
  }
  func.func @transform_3(%arg0: i32) -> (i32, i32) {
    %c0_i32 = arith.constant 0 : i32
    %c0_i32_0 = arith.constant 0 : i32
    return %arg0, %c0_i32 : i32, i32
  }
}

</mosaic_0001>

<bundles_post_ra>
// kernel: tpu_custom_call.1
= control target key start
LH: loop header
LB: loop body
LE: loop exit
PB: predicated region body
PF: predicated region fallthrough
CT: control target
= control target key end

     0   :  { %8 = vsyncpa [#allocation3], 0  ;;  %s619_s0 = inlined_call_operand.hbm [shape: f32[8,16], index: 0, kind: input, shape index: {}]   ;;  %s620_s1 = inlined_call_operand.hbm [shape: bf16[272,128], index: 1, kind: input, shape index: {}]   ;;  %s621_s2 = inlined_call_operand.hbm [shape: f32[3,128], index: 2, kind: input, shape index: {}]   ;;  %s622_s3 = inlined_call_operand.hbm [shape: f32[8,128], index: 3, kind: output, shape index: {}]  }
   0x1   :  { %9 = vsyncpa [#allocation6], 0 }
   0x2   :  { %10 = vsyncpa [#allocation4], 0  ;;  %s559_s12 = smov [#allocation5]  }
   0x3   :  { %s26_s13 = sshll.u32 %s559_s12, 4  ;;  %s27_s13 = int_to_ptr.vmem [resolvable:$true] %s26_s13 }
   0x4   :  { %s481_s14 = scalar_lea.vmem %s27_s13, 2176  ;;  %p486_p1 = scmp.lt.s32.totalorder %s27_s13, %s27_s13 }
   0x5   :  { %p482_p0 = scmp.ne.s32.totalorder %s27_s13, %s481_s14  ;;  %p487_p2 = scmp.lt.s32.totalorder %s481_s14, %s481_s14 }
   0x7   :  { %p488_p3 = por %p487_p2, %p486_p1 }
   0x9   :  { %p489_p4 = pnand %p488_p3, %p482_p0 }
   0xb   :  { %492 = shalt.err (!%p489_p4)
}
   0xc   :  { %s560_s15 = smov 64   ;;  %s561_s16 = smov 4  }
   0xd   :  { %32 = dma.hbm_to_vmem [thread:$0]  %s620_s1, 2176, %s27_s13, [#allocation6], %s560_s15, %s560_s15, %s561_s16  }
   0xe   :  { %s562_s19 = smov [#allocation2]   ;;  %s563_s21 = smov [#allocation7]  }
   0xf   :  { %s17_s20 = sshll.u32 %s562_s19, 4  ;;  %s39_s22 = sshll.u32 %s563_s21, 4  ;;  %s18_s20 = int_to_ptr.vmem [resolvable:$true] %s17_s20  ;;  %s40_s22 = int_to_ptr.vmem [resolvable:$true] %s39_s22 }
  0x10   :  { %s501_s23 = scalar_lea.vmem %s18_s20, 128  ;;  %p506_p6 = scmp.lt.s32.totalorder %s18_s20, %s18_s20 }
  0x11   :  { %p502_p5 = scmp.ne.s32.totalorder %s18_s20, %s501_s23  ;;  %p507_p7 = scmp.lt.s32.totalorder %s501_s23, %s501_s23 }
  0x13   :  { %p508_p8 = por %p507_p7, %p506_p6 }
  0x15   :  { %p509_p9 = pnand %p508_p8, %p502_p5 }
  0x17   :  { %512 = shalt.err (!%p509_p9)
}
  0x18   :  { %20 = dma.hbm_to_vmem [thread:$0]  %s619_s0, 128, %s18_s20, [#allocation3]  }
  0x19   :  { %s521_s26 = scalar_lea.vmem %s40_s22, 64  ;;  %p526_p11 = scmp.lt.s32.totalorder %s40_s22, %s40_s22 }
  0x1a   :  { %p522_p10 = scmp.ne.s32.totalorder %s40_s22, %s521_s26  ;;  %p527_p12 = scmp.lt.s32.totalorder %s521_s26, %s521_s26 }
  0x1c   :  { %p528_p13 = por %p527_p12, %p526_p11 }
  0x1e   :  { %p529_p0 = pnand %p528_p13, %p522_p10 }
  0x20   :  { %532 = shalt.err (!%p529_p0)
}
  0x21   :  { %42 = dma.hbm_to_vmem [thread:$0]  %s621_s2, 64, %s40_s22, [#allocation6]  }
  0x22   :  { %553 = dma.done.wait [#allocation3], 128  }
  0x23   :  { %554 = vsyncadd [#allocation3], 4294967168 }
  0x24   :  { %555 = dma.done.wait [#allocation6], 2240  }
  0x25   :  { %556 = vsyncadd [#allocation6], 4294965056  ;;  %v564_v0 = vmov 0.0   ;;  %vm565_vm0 = vmmov 0   ;;  %v452_v1 = vld [vmem:[#allocation5] sm:$0xff]   ;;  %v53_v2 = vld [vmem:[#allocation2] sm:$0xff] }
  0x26   :  { %398 = vmatprep.subr.bf16.mxu0 %v564_v0  ;;  %400 = vmatprep.mubr.msk.bf16.mxu0 %vm565_vm0, %v564_v0  ;;  %v54_v3 = vpack.c.bf16 %v53_v2, %v53_v2  ;;  %vm68_vm1 = vcmask 130048   ;;  %v453_v4 = vld [vmem:[#allocation5 + $0x40] sm:$0xff]   ;;  %v454_v5 = vld [vmem:[#allocation5 + $0x38] sm:$0xff]   ;;  %v455_v6 = vld [vmem:[#allocation5 + $0x30] sm:$0xff]   ;;  %s566_s0 = smov [#allocation8]  }
  0x27   :  { %404 = vmatprep.subr.bf16.mxu1 %v564_v0  ;;  %420 = vmatprep.mubr.msk.bf16.mxu1 %vm565_vm0, %v564_v0  ;;  %v456_v7 = vld [vmem:[#allocation5 + $0x28] sm:$0xff]   ;;  %v457_v8 = vld [vmem:[#allocation5 + $0x20] sm:$0xff]   ;;  %v458_v9 = vld [vmem:[#allocation5 + $0x18] sm:$0xff]   ;;  %s347_s2 = sshll.u32 %s566_s0, 4  ;;  %s348_s2 = int_to_ptr.vmem [resolvable:$true] %s347_s2 }
  0x28   :  { %399 = vmatpush3.bf16.msra.mxu0 %v452_v1  ;;  %405 = vmatpush3.bf16.msra.mxu1 %v453_v4  ;;  %v459_v10 = vld [vmem:[#allocation5 + $0x10] sm:$0xff]   ;;  %v460_v11 = vld [vmem:[#allocation5 + $0x8] sm:$0xff]   ;;  %v461_v12 = vld [vmem:[#allocation5 + $0x80] sm:$0xff]   ;;  %s533_s28 = scalar_lea.vmem %s348_s2, 128  ;;  %p538_p2 = scmp.lt.s32.totalorder %s348_s2, %s348_s2 }
  0x29   :  { %424 = vmatprep.subr.bf16.mxu0 %v564_v0  ;;  %406 = vmatprep.subr.bf16.mxu1 %v564_v0  ;;  %v462_v13 = vld [vmem:[#allocation5 + $0x78] sm:$0xff]   ;;  %v463_v14 = vld [vmem:[#allocation5 + $0x70] sm:$0xff]   ;;  %v464_v15 = vld [vmem:[#allocation5 + $0x68] sm:$0xff]   ;;  %p534_p1 = scmp.ne.s32.totalorder %s348_s2, %s533_s28  ;;  %p539_p3 = scmp.lt.s32.totalorder %s533_s28, %s533_s28 }
  0x2a   :  { %v465_v16 = vld [vmem:[#allocation5 + $0x60] sm:$0xff]   ;;  %v466_v17 = vld [vmem:[#allocation5 + $0x58] sm:$0xff]   ;;  %v357_v18 = vld [vmem:[#allocation7] ss:$0 sm:$0xff] }
  0x2b   :  { %401 = vmatmul.mubr.msk.bf16.vlgmr.msra.gmra.mxu0 %vm68_vm1, %v54_v3  ;;  %v467_v26 = vld [vmem:[#allocation5 + $0x50] sm:$0xff]   ;;  %v468_v27 = vld [vmem:[#allocation5 + $0x48] sm:$0xff]   ;;  %p540_p4 = por %p539_p3, %p538_p2 }
  0x2c   :  { %440 = vmatprep.mubr.msk.bf16.mxu0 %vm565_vm0, %v564_v0  ;;  %407 = vmatpush3.bf16.msra.mxu1 %v454_v5  ;;  %v360_v28 = vld [vmem:[#allocation7 + $0x1] ss:$0 sm:$0xff]  ;;  %v369_v36 = vld [vmem:[#allocation7 + $0x2] ss:$0 sm:$0xff] }
  0x2d   :  { %408 = vmatprep.subr.bf16.mxu1 %v564_v0  ;;  %425 = vmatpush3.bf16.msra.mxu0 %v461_v12  ;;  %p541_p5 = pnand %p540_p4, %p534_p1 }
  0x2e   :  { %426 = vmatprep.subr.bf16.mxu0 %v564_v0 }
  0x30   :  { %409 = vmatpush3.bf16.msra.mxu1 %v455_v6 }
  0x31   :  { %410 = vmatprep.subr.bf16.mxu1 %v564_v0  ;;  %427 = vmatpush3.bf16.msra.mxu0 %v462_v13 }
  0x32   :  { %428 = vmatprep.subr.bf16.mxu0 %v564_v0 }
  0x34   :  { %411 = vmatpush3.bf16.msra.mxu1 %v456_v7 }
  0x35   :  { %412 = vmatprep.subr.bf16.mxu1 %v564_v0  ;;  %429 = vmatpush3.bf16.msra.mxu0 %v463_v14 }
  0x36   :  { %430 = vmatprep.subr.bf16.mxu0 %v564_v0 }
  0x38   :  { %413 = vmatpush3.bf16.msra.mxu1 %v457_v8 }
  0x39   :  { %414 = vmatprep.subr.bf16.mxu1 %v564_v0  ;;  %431 = vmatpush3.bf16.msra.mxu0 %v464_v15 }
  0x3a   :  { %432 = vmatprep.subr.bf16.mxu0 %v564_v0 }
  0x3c   :  { %415 = vmatpush3.bf16.msra.mxu1 %v458_v9 }
  0x3d   :  { %416 = vmatprep.subr.bf16.mxu1 %v564_v0  ;;  %433 = vmatpush3.bf16.msra.mxu0 %v465_v16 }
  0x3e   :  { %434 = vmatprep.subr.bf16.mxu0 %v564_v0 }
  0x40   :  { %417 = vmatpush3.bf16.msra.mxu1 %v459_v10 }
  0x41   :  { %418 = vmatprep.subr.bf16.mxu1 %v564_v0  ;;  %435 = vmatpush3.bf16.msra.mxu0 %v466_v17 }
  0x42   :  { %436 = vmatprep.subr.bf16.mxu0 %v564_v0 }
  0x44   :  { %419 = vmatpush3.bf16.msra.mxu1 %v460_v11 }
  0x45   :  { %437 = vmatpush3.bf16.msra.mxu0 %v467_v26 }
  0x46   :  { %438 = vmatprep.subr.bf16.mxu0 %v564_v0 }
  0x49   :  { %439 = vmatpush3.bf16.msra.mxu0 %v468_v27 }
  0xeb   :  { %v106_v19 = vpop.f32.mrf.mxu0 }
  0xec   :  { %v107_v20 = vadd.f32 %v357_v18, %v106_v19 }
  0xed   :  { %v402_v21 = vpop.f32.mrf.mxu0 }
  0xee   :  { %v112_v22 = vmax.f32 %v107_v20, 0.0 }
  0xef   :  { %v109_v23 = vpop.f32.mrf.mxu0 }
  0xf0   :  { %v113_v24 = vpack.c.bf16 %v112_v22, %v112_v22 }
  0xf1   :  { %v403_v25 = vpop.f32.mrf.mxu0 }
  0xf2   :  { %421 = vmatmul.mubr.bf16.vlgmr.msra.gmra.mxu1 %v113_v24 }
 0x1b2   :  { %v217_v29 = vpop.f32.mrf.mxu1 }
 0x1b3   :  { %v218_v30 = vadd.f32 %v360_v28, %v217_v29 }
 0x1b4   :  { %v422_v31 = vpop.f32.mrf.mxu1 }
 0x1b5   :  { %v223_v32 = vmax.f32 %v218_v30, 0.0 }
 0x1b6   :  { %v220_v33 = vpop.f32.mrf.mxu1 }
 0x1b7   :  { %v224_v34 = vpack.c.bf16 %v223_v32, %v223_v32 }
 0x1b8   :  { %v423_v35 = vpop.f32.mrf.mxu1 }
 0x1b9   :  { %441 = vmatmul.mubr.bf16.vlgmr.msra.gmra.mxu0 %v224_v34 }
 0x279   :  { %v328_v37 = vpop.f32.mrf.mxu0 }
 0x27a   :  { %v329_v38 = vadd.f32 %v369_v36, %v328_v37 }
 0x27b   :  { %v442_v39 = vpop.f32.mrf.mxu0 }
 0x27c   :  { %v334_v40 = vsub.f32 0.0, %v329_v38 }
 0x27d   :  { %v331_v41 = vpop.f32.mrf.mxu0 }
 0x27e   :  { %v335_v42 = vmul.f32 1.442695, %v334_v40 }
 0x27f   :  { %v443_v43 = vpop.f32.mrf.mxu0 }
 0x280   :  { %469 = vpow2.f32 %v335_v42 }
 0x28d   :  { %v470_v44 = vpop.eup %469 }
 0x28e   :  { %v337_v45 = vadd.f32 1.0, %v470_v44 }
 0x290   :  { %471 = vrcp.f32 %v337_v45 }
 0x29d   :  { %v472_v46 = vpop.eup %471 }
 0x29e   :  { %v339_v47 = vmul.f32 2.0, %v472_v46 }
 0x2a0   :  { %340 = vst [vmem:[#allocation8] sm:$0xff] %v339_v47 }
 0x2a1   :  { %544 = shalt.err (!%p541_p5)
}
 0x2a2   :  { %350 = dma.vmem_to_hbm [thread:$0]  %s348_s2, 128, %s622_s3, [#allocation4]  }
 0x2a3   :  { %557 = dma.done.wait [#allocation4], 128  }
 0x2a4   :  { %558 = vsyncadd [#allocation4], 4294967168 }
 0x2a5   :  { %354 = vsyncpa [#allocation3], 1 }
 0x2a6   :  { %355 = vsyncpa [#allocation6], 1 }
 0x2a7   :  { %356 = vsyncpa [#allocation4], 1 }

</bundles_post_ra>
